<compile_context>
chip_gen: v6e
topology: v6e:2x2x1
jax: 0.10.0
libtpu: 0.0.40
codegen_flags: <defaults>
</compile_context>

<pallas_src>
import math

import jax
import jax.numpy as jnp
from jax.experimental import pallas as pl
from jax.experimental.pallas import tpu as pltpu


# ------------------------------- kernel --------------------------------------
def _dot_attn_kernel(x_ref, a_ref, b_attn_ref, vo_ref, out_ref):
    f32 = jnp.float32

    # logits = Wq(x) @ Wk(centroids).T / sqrt(n_dot)   (scale & Wq folded into A)
    logits = jnp.dot(x_ref[...], a_ref[...], preferred_element_type=f32)
    logits = logits + b_attn_ref[...]                              # (TN, C)

    # softmax over centroids (last axis); reciprocal on the EUP
    logits = logits - jnp.max(logits, axis=-1, keepdims=True)
    e = jnp.exp(logits)
    inv = pl.reciprocal(jnp.sum(e, axis=-1, keepdims=True), approx=True)
    p = e * inv                                                    # (TN, C)

    # out = Wo(attn_score @ Wv(centroids));  Wv/Wo weights and wo_b folded into VO'
    out = jnp.dot(p, vo_ref[...], preferred_element_type=f32)
    out_ref[...] = out.astype(out_ref.dtype)


# ------------------------------- wrapper --------------------------------------
def dot_attention(x, params, *, tile_n=8192):
    """DotAttention forward.  x: (N, ndim) -> (N, ndim)."""
    x = x.astype(jnp.float32)
    N, ndim = x.shape
    p = params
    n_dot = p["wq_w"].shape[1]
    C = p["centroids"].shape[0]
    scale = 1.0 / math.sqrt(n_dot)

    # ---- grid-invariant precompute, hoisted out of the kernel (plain JAX) ----
    k = p["centroids"] @ p["wk_w"] + p["wk_b"]          # (C, n_dot)
    v = p["centroids"] @ p["wv_w"] + p["wv_b"]          # (C, n_hidden)
    kT_scaled = k.T * scale                             # (n_dot, C)
    A = p["wq_w"] @ kT_scaled                           # (ndim, C)
    b_attn = (p["wq_b"] @ kT_scaled).reshape(1, C)      # (1, C)
    # softmax rows sum to 1  =>  p @ (VO + wo_b) == p @ VO + wo_b
    VO = v @ p["wo_w"] + p["wo_b"].reshape(1, ndim)     # (C, ndim), bias folded

    # ---- token tiling: big tiles, pad N to a tile multiple, slice back ----
    tile_n = int(min(tile_n, pl.next_power_of_2(max(N, 8))))
    tile_n = max(tile_n, 8)
    n_pad = pl.cdiv(N, tile_n) * tile_n
    if n_pad != N:
        x = jnp.pad(x, ((0, n_pad - N), (0, 0)))

    def full_spec(arr):
        # small constant operand, fully resident in VMEM every grid step
        return pl.BlockSpec(arr.shape, lambda i: (0, 0))

    grid_spec = pltpu.PrefetchScalarGridSpec(
        num_scalar_prefetch=0,
        grid=(n_pad // tile_n,),
        in_specs=[
            pl.BlockSpec((tile_n, ndim), lambda i: (i, 0)),   # x tile
            full_spec(A), full_spec(b_attn), full_spec(VO),
        ],
        out_specs=pl.BlockSpec((tile_n, ndim), lambda i: (i, 0)),
    )

    out = pl.pallas_call(
        _dot_attn_kernel,
        out_shape=jax.ShapeDtypeStruct((n_pad, ndim), jnp.float32),
        grid_spec=grid_spec,
        compiler_params=pltpu.CompilerParams(
            dimension_semantics=("parallel",),
        ),
    )(x, A, b_attn, VO)

    return out[:N]


# ----------------------------- parameter setup --------------------------------
def init_params(key, *, ndim, n_centroids, n_dot, n_hidden):
    """Matches torch: nn.Linear weights stored pre-transposed (in, out)."""
    ks = jax.random.split(key, 9)

    def linear(kw, kb, fan_in, fan_out):
        bound = 1.0 / math.sqrt(fan_in)
        w = jax.random.uniform(kw, (fan_in, fan_out), jnp.float32, -bound, bound)
        b = jax.random.uniform(kb, (1, fan_out), jnp.float32, -bound, bound)
        return w, b

    wq_w, wq_b = linear(ks[0], ks[1], ndim, n_dot)
    wk_w, wk_b = linear(ks[2], ks[3], ndim, n_dot)
    wv_w, wv_b = linear(ks[4], ks[5], ndim, n_hidden)
    wo_w, wo_b = linear(ks[6], ks[7], n_hidden, ndim)
    centroids = jax.random.normal(ks[8], (n_centroids, ndim), jnp.float32)

    return dict(wq_w=wq_w, wq_b=wq_b, wk_w=wk_w, wk_b=wk_b,
                wv_w=wv_w, wv_b=wv_b, wo_w=wo_w, wo_b=wo_b,
                centroids=centroids)


# --------------------------- pure-JAX reference --------------------------------
def reference_forward(x, p):
    n_dot = p["wq_w"].shape[1]
    q = x @ p["wq_w"] + p["wq_b"]
    k = p["centroids"] @ p["wk_w"] + p["wk_b"]
    v = p["centroids"] @ p["wv_w"] + p["wv_b"]
    attn_score = jax.nn.softmax((q @ k.T) / math.sqrt(n_dot), axis=1)
    return (attn_score @ v) @ p["wo_w"] + p["wo_b"]


if __name__ == "__main__":
    ndim = 8
    n_centroids = 32
    n_dot = 64
    n_hidden = 64
    npnts = 100          # as in the original script; not a tile multiple -> exercises padding

    key = jax.random.PRNGKey(0)
    kp, kx = jax.random.split(key)
    params = init_params(kp, ndim=ndim, n_centroids=n_centroids,
                         n_dot=n_dot, n_hidden=n_hidden)
    x = jax.random.normal(kx, (npnts, ndim), jnp.float32)

    out = jax.block_until_ready(dot_attention(x, params))
    ref = reference_forward(x, params)

    assert out.shape == (npnts, ndim)
    err = float(jnp.max(jnp.abs(out - ref)))
    # approx reciprocal in the softmax denominator -> allow 1e-3
    assert err < 1e-3, f"max abs err {err}"

    print("KERNEL_OK")
</pallas_src>

<mosaic_0001>
module attributes {stable_mosaic.version = 11 : i64} {
  func.func @_dot_attn_kernel(%arg0: i32, %arg1: memref<128x8xf32, #tpu.memory_space<vmem>>, %arg2: memref<8x32xf32, #tpu.memory_space<vmem>>, %arg3: memref<1x32xf32, #tpu.memory_space<vmem>>, %arg4: memref<32x8xf32, #tpu.memory_space<vmem>>, %arg5: memref<128x8xf32, #tpu.memory_space<vmem>>) attributes {dimension_semantics = [#tpu.dimension_semantics<parallel>], iteration_bounds = array<i64: 1>, scalar_prefetch = 0 : i64, scratch_operands = 0 : i64, tpu.core_type = #tpu.core_type<tc>, window_params = [{transform_indices = @transform_0, window_bounds = array<i64: 128, 8>}, {pipeline_mode = #tpu.pipeline_mode<synchronous>, transform_indices = @transform_1, window_bounds = array<i64: 8, 32>}, {pipeline_mode = #tpu.pipeline_mode<synchronous>, transform_indices = @transform_2, window_bounds = array<i64: 1, 32>}, {pipeline_mode = #tpu.pipeline_mode<synchronous>, transform_indices = @transform_3, window_bounds = array<i64: 32, 8>}, {transform_indices = @transform_4, window_bounds = array<i64: 128, 8>}]} {
    %c0 = arith.constant 0 : index
    %c0_0 = arith.constant 0 : index
    %0 = vector.load %arg1[%c0, %c0_0] : memref<128x8xf32, #tpu.memory_space<vmem>>, vector<128x8xf32>
    %c0_1 = arith.constant 0 : index
    %c0_2 = arith.constant 0 : index
    %1 = vector.load %arg2[%c0_1, %c0_2] : memref<8x32xf32, #tpu.memory_space<vmem>>, vector<8x32xf32>
    %cst = arith.constant dense<0.000000e+00> : vector<128x32xf32>
    %2 = tpu.matmul %0, %1, %cst {dimension_numbers = #tpu.dot_dimension_numbers<[1], [0], [0], [1], [0, 0, 1, 1], [], []>} : vector<128x8xf32>, vector<8x32xf32>, vector<128x32xf32> -> vector<128x32xf32>
    %c0_3 = arith.constant 0 : index
    %c0_4 = arith.constant 0 : index
    %3 = vector.load %arg3[%c0_3, %c0_4] : memref<1x32xf32, #tpu.memory_space<vmem>>, vector<1x32xf32>
    %4 = vector.broadcast %3 : vector<1x32xf32> to vector<128x32xf32>
    %5 = arith.addf %2, %4 : vector<128x32xf32>
    %cst_5 = arith.constant dense<0xFF800000> : vector<128xf32>
    %6 = vector.multi_reduction <maximumf>, %5, %cst_5 [1] : vector<128x32xf32> to vector<128xf32>
    %7 = vector.shape_cast %6 : vector<128xf32> to vector<128x1xf32>
    %8 = vector.broadcast %7 : vector<128x1xf32> to vector<128x32xf32>
    %9 = arith.subf %5, %8 : vector<128x32xf32>
    %10 = math.exp %9 : vector<128x32xf32>
    %cst_6 = arith.constant dense<0.000000e+00> : vector<128xf32>
    %11 = vector.multi_reduction <add>, %10, %cst_6 [1] : vector<128x32xf32> to vector<128xf32>
    %12 = vector.shape_cast %11 : vector<128xf32> to vector<128x1xf32>
    %13 = tpu.reciprocal %12 {approx = true} : vector<128x1xf32> -> vector<128x1xf32>
    %14 = vector.broadcast %13 : vector<128x1xf32> to vector<128x32xf32>
    %15 = arith.mulf %10, %14 : vector<128x32xf32>
    %c0_7 = arith.constant 0 : index
    %c0_8 = arith.constant 0 : index
    %16 = vector.load %arg4[%c0_7, %c0_8] : memref<32x8xf32, #tpu.memory_space<vmem>>, vector<32x8xf32>
    %cst_9 = arith.constant dense<0.000000e+00> : vector<128x8xf32>
    %17 = tpu.matmul %15, %16, %cst_9 {dimension_numbers = #tpu.dot_dimension_numbers<[1], [0], [0], [1], [0, 0, 1, 1], [], []>} : vector<128x32xf32>, vector<32x8xf32>, vector<128x8xf32> -> vector<128x8xf32>
    %c0_10 = arith.constant 0 : index
    %c0_11 = arith.constant 0 : index
    %18 = vector.load %arg5[%c0_10, %c0_11] : memref<128x8xf32, #tpu.memory_space<vmem>>, vector<128x8xf32>
    tpu.vector_store %arg5[%c0_10, %c0_11], %17 {strides = array<i32>} : memref<128x8xf32, #tpu.memory_space<vmem>>, vector<128x8xf32>,
    return
  }
  func.func @transform_0(%arg0: i32) -> (i32, i32) {
    %c0_i32 = arith.constant 0 : i32
    %c0_i32_0 = arith.constant 0 : i32
    return %arg0, %c0_i32 : i32, i32
  }
  func.func @transform_1(%arg0: i32) -> (i32, i32) {
    %c0_i32 = arith.constant 0 : i32
    %c0_i32_0 = arith.constant 0 : i32
    %c0_i32_1 = arith.constant 0 : i32
    return %c0_i32, %c0_i32_0 : i32, i32
  }
  func.func @transform_2(%arg0: i32) -> (i32, i32) {
    %c0_i32 = arith.constant 0 : i32
    %c0_i32_0 = arith.constant 0 : i32
    %c0_i32_1 = arith.constant 0 : i32
    return %c0_i32, %c0_i32_0 : i32, i32
  }
  func.func @transform_3(%arg0: i32) -> (i32, i32) {
    %c0_i32 = arith.constant 0 : i32
    %c0_i32_0 = arith.constant 0 : i32
    %c0_i32_1 = arith.constant 0 : i32
    return %c0_i32, %c0_i32_0 : i32, i32
  }
  func.func @transform_4(%arg0: i32) -> (i32, i32) {
    %c0_i32 = arith.constant 0 : i32
    %c0_i32_0 = arith.constant 0 : i32
    return %arg0, %c0_i32 : i32, i32
  }
}

</mosaic_0001>

<bundles_post_ra>
// kernel: tpu_custom_call.1
= control target key start
LH: loop header
LB: loop body
LE: loop exit
PB: predicated region body
PF: predicated region fallthrough
CT: control target
= control target key end

     0   :  { %vm41_vm0 = vcmask 64512   ;;  %vm235_vm1 = vcmask 261120   ;;  %s1168_s1 = inlined_call_operand.vmem [shape: f32[8,32], index: 1, kind: input, shape index: {}]   ;;  %s1169_s0 = inlined_call_operand.vmem [shape: f32[128,8], index: 0, kind: input, shape index: {}]   ;;  %s1170_s2 = inlined_call_operand.vmem [shape: f32[1,32], index: 2, kind: input, shape index: {}]   ;;  %s1171_s3 = inlined_call_operand.vmem [shape: f32[32,8], index: 3, kind: input, shape index: {}]   ;;  %s1172_s4 = inlined_call_operand.vmem [shape: f32[128,8], index: 4, kind: output, shape index: {}]  }
   0x1   :  { %v33_v0 = vld [vmem:[%s1168_s1] sm:$0xff]  ;;  %v18_v2 = vld [vmem:[%s1169_s0 + $0x8] sm:$0xff]  ;;  %v19_v3 = vld [vmem:[%s1169_s0 + $0x10] sm:$0xff] }
   0x2   :  { %v17_v1 = vld [vmem:[%s1169_s0] sm:$0xff]  ;;  %699 = vmatprep.subr.mxu0 %v33_v0  ;;  %v20_v4 = vld [vmem:[%s1169_s0 + $0x18] sm:$0xff]  ;;  %v22_v6 = vld [vmem:[%s1169_s0 + $0x28] sm:$0xff] }
   0x3   :  { %701 = vmatprep.mubr.msk.f32.mxu0 %vm41_vm0, %v17_v1  ;;  %700 = vmatpush3.msra.mxu0 %v33_v0  ;;  %v21_v5 = vld [vmem:[%s1169_s0 + $0x20] sm:$0xff]  ;;  %v23_v7 = vld [vmem:[%s1169_s0 + $0x30] sm:$0xff]  ;;  %v24_v8 = vld [vmem:[%s1169_s0 + $0x38] sm:$0xff] }
   0x4   :  { %702 = vmatmul.mubr.msk.f32.vlgmr.msra.gmra.mxu0 %vm41_vm0, %v18_v2  ;;  %v25_v9 = vld [vmem:[%s1169_s0 + $0x40] sm:$0xff]  ;;  %v26_v10 = vld [vmem:[%s1169_s0 + $0x48] sm:$0xff]  ;;  %v27_v11 = vld [vmem:[%s1169_s0 + $0x50] sm:$0xff] }
   0x5   :  { %704 = vmatprep.mubr.msk.f32.mxu0 %vm41_vm0, %v19_v3  ;;  %v28_v12 = vld [vmem:[%s1169_s0 + $0x58] sm:$0xff]  ;;  %v29_v13 = vld [vmem:[%s1169_s0 + $0x60] sm:$0xff]  ;;  %v30_v14 = vld [vmem:[%s1169_s0 + $0x68] sm:$0xff] }
   0x6   :  { %v31_v15 = vld [vmem:[%s1169_s0 + $0x70] sm:$0xff]  ;;  %v32_v16 = vld [vmem:[%s1169_s0 + $0x78] sm:$0xff]  ;;  %v629_v18 = vld [vmem:[%s1170_s2] ss:$0 sm:$0xff] }
   0x8   :  { %705 = vmatmul.mubr.msk.f32.gmra.mxu0 %vm41_vm0, %v20_v4 }
   0x9   :  { %707 = vmatprep.mubr.msk.f32.mxu0 %vm41_vm0, %v21_v5 }
   0xc   :  { %708 = vmatmul.mubr.msk.f32.gmra.mxu0 %vm41_vm0, %v22_v6 }
   0xd   :  { %710 = vmatprep.mubr.msk.f32.mxu0 %vm41_vm0, %v23_v7 }
  0x10   :  { %711 = vmatmul.mubr.msk.f32.gmra.mxu0 %vm41_vm0, %v24_v8 }
  0x11   :  { %713 = vmatprep.mubr.msk.f32.mxu0 %vm41_vm0, %v25_v9 }
  0x14   :  { %714 = vmatmul.mubr.msk.f32.gmra.mxu0 %vm41_vm0, %v26_v10 }
  0x15   :  { %716 = vmatprep.mubr.msk.f32.mxu0 %vm41_vm0, %v27_v11 }
  0x18   :  { %717 = vmatmul.mubr.msk.f32.gmra.mxu0 %vm41_vm0, %v28_v12 }
  0x19   :  { %719 = vmatprep.mubr.msk.f32.mxu0 %vm41_vm0, %v29_v13 }
  0x1c   :  { %720 = vmatmul.mubr.msk.f32.gmra.mxu0 %vm41_vm0, %v30_v14 }
  0x1d   :  { %722 = vmatprep.mubr.msk.f32.mxu0 %vm41_vm0, %v31_v15 }
  0x20   :  { %723 = vmatmul.mubr.msk.f32.gmra.mxu0 %vm41_vm0, %v32_v16 }
  0xc4   :  { %v703_v17 = vpop.f32.mrf.mxu0 }
  0xc5   :  { %v918_v22 = vadd.f32 %v703_v17, %v629_v18 }
  0xc6   :  { %v156_v19 = vpop.f32.mrf.mxu0 }
  0xc7   :  { %v916_v20 = vadd.f32 %v629_v18, %v156_v19  ;;  %v239_v29 = vsel %vm235_vm1, %v918_v22, -inf }
  0xc8   :  { %v706_v21 = vpop.f32.mrf.mxu0 }
  0xc9   :  { %v236_v23 = vsel %vm235_vm1, %v916_v20, -inf  ;;  %v924_v27 = vadd.f32 %v706_v21, %v629_v18 }
  0xca   :  { %v166_v24 = vpop.f32.mrf.mxu0  ;;  %237 = vmax.xlane.f32.xlu0 %v236_v23 }
  0xcb   :  { %v922_v25 = vadd.f32 %v629_v18, %v166_v24  ;;  %v245_v34 = vsel %vm235_vm1, %v924_v27, -inf }
  0xcc   :  { %v709_v26 = vpop.f32.mrf.mxu0 }
  0xcd   :  { %v242_v28 = vsel %vm235_vm1, %v922_v25, -inf  ;;  %v932_v33 = vadd.f32 %v709_v26, %v629_v18 }
  0xce   :  { %v176_v30 = vpop.f32.mrf.mxu0  ;;  %243 = vmax.xlane.f32.xlu1 %v242_v28  ;;  %240 = vmax.xlane.f32.xlu0 %v239_v29 }
  0xcf   :  { %v930_v31 = vadd.f32 %v629_v18, %v176_v30  ;;  %v251_v40 = vsel %vm235_vm1, %v932_v33, -inf }
  0xd0   :  { %v712_v32 = vpop.f32.mrf.mxu0 }
  0xd1   :  { %v248_v35 = vsel %vm235_vm1, %v930_v31, -inf  ;;  %v940_v39 = vadd.f32 %v712_v32, %v629_v18 }
  0xd2   :  { %v186_v36 = vpop.f32.mrf.mxu0  ;;  %246 = vmax.xlane.f32.xlu1 %v245_v34  ;;  %249 = vmax.xlane.f32.xlu0 %v248_v35 }
  0xd3   :  { %v938_v37 = vadd.f32 %v629_v18, %v186_v36  ;;  %v257_v46 = vsel %vm235_vm1, %v940_v39, -inf }
  0xd4   :  { %v715_v38 = vpop.f32.mrf.mxu0 }
  0xd5   :  { %v254_v41 = vsel %vm235_vm1, %v938_v37, -inf  ;;  %v948_v45 = vadd.f32 %v715_v38, %v629_v18 }
  0xd6   :  { %v196_v42 = vpop.f32.mrf.mxu0  ;;  %252 = vmax.xlane.f32.xlu1 %v251_v40  ;;  %255 = vmax.xlane.f32.xlu0 %v254_v41 }
  0xd7   :  { %v946_v43 = vadd.f32 %v629_v18, %v196_v42  ;;  %v263_v52 = vsel %vm235_vm1, %v948_v45, -inf }
  0xd8   :  { %v718_v44 = vpop.f32.mrf.mxu0 }
  0xd9   :  { %v260_v47 = vsel %vm235_vm1, %v946_v43, -inf  ;;  %v956_v51 = vadd.f32 %v718_v44, %v629_v18 }
  0xda   :  { %v206_v48 = vpop.f32.mrf.mxu0  ;;  %258 = vmax.xlane.f32.xlu1 %v257_v46  ;;  %261 = vmax.xlane.f32.xlu0 %v260_v47 }
  0xdb   :  { %v954_v49 = vadd.f32 %v629_v18, %v206_v48  ;;  %v269_v58 = vsel %vm235_vm1, %v956_v51, -inf }
  0xdc   :  { %v721_v50 = vpop.f32.mrf.mxu0 }
  0xdd   :  { %v266_v53 = vsel %vm235_vm1, %v954_v49, -inf  ;;  %v964_v57 = vadd.f32 %v721_v50, %v629_v18 }
  0xde   :  { %v216_v54 = vpop.f32.mrf.mxu0  ;;  %264 = vmax.xlane.f32.xlu1 %v263_v52  ;;  %267 = vmax.xlane.f32.xlu0 %v266_v53 }
  0xdf   :  { %v962_v55 = vadd.f32 %v629_v18, %v216_v54  ;;  %v275_v63 = vsel %vm235_vm1, %v964_v57, -inf }
  0xe0   :  { %v724_v56 = vpop.f32.mrf.mxu0 }
  0xe1   :  { %v272_v59 = vsel %vm235_vm1, %v962_v55, -inf  ;;  %v972_v62 = vadd.f32 %v724_v56, %v629_v18 }
  0xe2   :  { %v226_v60 = vpop.f32.mrf.mxu0  ;;  %270 = vmax.xlane.f32.xlu1 %v269_v58  ;;  %273 = vmax.xlane.f32.xlu0 %v272_v59 }
  0xe3   :  { %v970_v61 = vadd.f32 %v629_v18, %v226_v60  ;;  %v281_v1 = vsel %vm235_vm1, %v972_v62, -inf }
  0xe5   :  { %v278_v0 = vsel %vm235_vm1, %v970_v61, -inf }
  0xe6   :  { %276 = vmax.xlane.f32.xlu1 %v275_v63  ;;  %279 = vmax.xlane.f32.xlu0 %v278_v0 }
  0xea   :  { %282 = vmax.xlane.f32.xlu1 %v281_v1 }
 0x153   :  { %v238_v2 = vpop.xlane.xlu0 %237 }
 0x154   :  { %v284_v3 = vsub.f32 %v916_v20, %v238_v2 }
 0x156   :  { %v300_v4 = vmul.f32 1.442695, %v284_v3 }
 0x157   :  { %v244_v5 = vpop.xlane.xlu1 %243  ;;  %v241_v6 = vpop.xlane.xlu0 %240 }
 0x158   :  { %757 = vpow2.f32 %v300_v4  ;;  %v286_v7 = vsub.f32 %v922_v25, %v244_v5  ;;  %v285_v8 = vsub.f32 %v918_v22, %v241_v6 }
 0x15a   :  { %v304_v9 = vmul.f32 1.442695, %v286_v7  ;;  %v302_v10 = vmul.f32 1.442695, %v285_v8 }
 0x15b   :  { %v247_v11 = vpop.xlane.xlu1 %246  ;;  %v250_v12 = vpop.xlane.xlu0 %249 }
 0x15c   :  { %759 = vpow2.f32 %v304_v9  ;;  %v287_v13 = vsub.f32 %v924_v27, %v247_v11  ;;  %v288_v14 = vsub.f32 %v930_v31, %v250_v12  ;;  %v415_v11 = vld [vmem:[%s1171_s3 + $0x18] sm:$0xff] }
 0x15d   :  { %761 = vpow2.f32 %v302_v10  ;;  %725 = vmatprep.subr.mxu1 %v415_v11 }
 0x15e   :  { %v306_v15 = vmul.f32 1.442695, %v287_v13  ;;  %v308_v16 = vmul.f32 1.442695, %v288_v14  ;;  %v414_v13 = vld [vmem:[%s1171_s3 + $0x10] sm:$0xff]  ;;  %726 = vmatpush3.msra.mxu1 %v415_v11 }
 0x15f   :  { %v253_v17 = vpop.xlane.xlu1 %252  ;;  %v256_v18 = vpop.xlane.xlu0 %255  ;;  %727 = vmatprep.subr.mxu1 %v414_v13 }
 0x160   :  { %763 = vpow2.f32 %v306_v15  ;;  %v289_v19 = vsub.f32 %v932_v33, %v253_v17  ;;  %v290_v20 = vsub.f32 %v938_v37, %v256_v18  ;;  %v413_v17 = vld [vmem:[%s1171_s3 + $0x8] sm:$0xff]  ;;  %728 = vmatpush3.msra.mxu1 %v414_v13 }
 0x161   :  { %765 = vpow2.f32 %v308_v16  ;;  %729 = vmatprep.subr.mxu1 %v413_v17 }
 0x162   :  { %v310_v21 = vmul.f32 1.442695, %v289_v19  ;;  %v312_v22 = vmul.f32 1.442695, %v290_v20  ;;  %v412_v19 = vld [vmem:[%s1171_s3] sm:$0xff]  ;;  %730 = vmatpush3.msra.mxu1 %v413_v17 }
 0x163   :  { %v259_v23 = vpop.xlane.xlu1 %258  ;;  %v262_v24 = vpop.xlane.xlu0 %261  ;;  %731 = vmatprep.subr.mxu1 %v412_v19 }
 0x164   :  { %767 = vpow2.f32 %v310_v21  ;;  %v291_v25 = vsub.f32 %v940_v39, %v259_v23  ;;  %v292_v26 = vsub.f32 %v946_v43, %v262_v24  ;;  %732 = vmatpush3.msra.mxu1 %v412_v19 }
 0x165   :  { %v989_v27 = vpop.eup %757  ;;  %769 = vpow2.f32 %v312_v22 }
 0x166   :  { %v314_v28 = vmul.f32 1.442695, %v291_v25  ;;  %v316_v29 = vmul.f32 1.442695, %v292_v26  ;;  %v332_v30 = vsel %vm235_vm1, %v989_v27, 0.0 }
 0x167   :  { %v265_v31 = vpop.xlane.xlu1 %264  ;;  %333 = vadd.xlane.f32.xlu0 %v332_v30  ;;  %v268_v32 = vpop.xlane.xlu0 %267 }
 0x168   :  { %771 = vpow2.f32 %v314_v28  ;;  %v293_v33 = vsub.f32 %v948_v45, %v265_v31  ;;  %v294_v34 = vsub.f32 %v954_v49, %v268_v32 }
 0x169   :  { %v995_v35 = vpop.eup %759  ;;  %773 = vpow2.f32 %v316_v29 }
 0x16a   :  { %v997_v36 = vpop.eup %761  ;;  %v318_v37 = vmul.f32 1.442695, %v293_v33  ;;  %v320_v38 = vmul.f32 1.442695, %v294_v34  ;;  %v338_v39 = vsel %vm235_vm1, %v995_v35, 0.0 }
 0x16b   :  { %v271_v40 = vpop.xlane.xlu1 %270  ;;  %339 = vadd.xlane.f32.xlu0 %v338_v39  ;;  %v335_v41 = vsel %vm235_vm1, %v997_v36, 0.0  ;;  %v274_v42 = vpop.xlane.xlu0 %273 }
 0x16c   :  { %775 = vpow2.f32 %v318_v37  ;;  %v295_v43 = vsub.f32 %v956_v51, %v271_v40  ;;  %336 = vadd.xlane.f32.xlu1 %v335_v41  ;;  %v296_v44 = vsub.f32 %v962_v55, %v274_v42 }
 0x16d   :  { %v1005_v45 = vpop.eup %763  ;;  %777 = vpow2.f32 %v320_v38 }
 0x16e   :  { %v1007_v46 = vpop.eup %765  ;;  %v322_v47 = vmul.f32 1.442695, %v295_v43  ;;  %v324_v48 = vmul.f32 1.442695, %v296_v44  ;;  %v341_v49 = vsel %vm235_vm1, %v1005_v45, 0.0 }
 0x16f   :  { %v277_v50 = vpop.xlane.xlu1 %276  ;;  %v344_v52 = vsel %vm235_vm1, %v1007_v46, 0.0  ;;  %v280_v53 = vpop.xlane.xlu0 %279 }
 0x170   :  { %779 = vpow2.f32 %v322_v47  ;;  %v297_v51 = vsub.f32 %v964_v57, %v277_v50  ;;  %342 = vadd.xlane.f32.xlu1 %v341_v49  ;;  %345 = vadd.xlane.f32.xlu0 %v344_v52  ;;  %v298_v54 = vsub.f32 %v970_v61, %v280_v53 }
 0x171   :  { %v1015_v55 = vpop.eup %767  ;;  %781 = vpow2.f32 %v324_v48 }
 0x172   :  { %v1017_v56 = vpop.eup %769  ;;  %v326_v58 = vmul.f32 1.442695, %v297_v51  ;;  %v328_v59 = vmul.f32 1.442695, %v298_v54  ;;  %v347_v60 = vsel %vm235_vm1, %v1015_v55, 0.0 }
 0x173   :  { %v283_v63 = vpop.xlane.xlu1 %282  ;;  %v350_v0 = vsel %vm235_vm1, %v1017_v56, 0.0 }
 0x174   :  { %783 = vpow2.f32 %v326_v58  ;;  %v299_v57 = vsub.f32 %v972_v62, %v283_v63  ;;  %348 = vadd.xlane.f32.xlu1 %v347_v60  ;;  %351 = vadd.xlane.f32.xlu0 %v350_v0 }
 0x175   :  { %v1024_v61 = vpop.eup %771  ;;  %785 = vpow2.f32 %v328_v59 }
 0x176   :  { %v1026_v1 = vpop.eup %773  ;;  %v330_v2 = vmul.f32 1.442695, %v299_v57  ;;  %v353_v3 = vsel %vm235_vm1, %v1024_v61, 0.0 }
 0x177   :  { %v356_v4 = vsel %vm235_vm1, %v1026_v1, 0.0 }
 0x178   :  { %787 = vpow2.f32 %v330_v2  ;;  %354 = vadd.xlane.f32.xlu1 %v353_v3  ;;  %357 = vadd.xlane.f32.xlu0 %v356_v4 }
 0x179   :  { %v1032_v5 = vpop.eup %775 }
 0x17a   :  { %v1034_v62 = vpop.eup %777  ;;  %v359_v6 = vsel %vm235_vm1, %v1032_v5, 0.0 }
 0x17b   :  { %v362_v7 = vsel %vm235_vm1, %v1034_v62, 0.0 }
 0x17c   :  { %360 = vadd.xlane.f32.xlu1 %v359_v6  ;;  %363 = vadd.xlane.f32.xlu0 %v362_v7 }
 0x17d   :  { %v1040_v8 = vpop.eup %779 }
 0x17e   :  { %v1042_v9 = vpop.eup %781  ;;  %v365_v10 = vsel %vm235_vm1, %v1040_v8, 0.0 }
 0x17f   :  { %v368_v12 = vsel %vm235_vm1, %v1042_v9, 0.0 }
 0x180   :  { %366 = vadd.xlane.f32.xlu1 %v365_v10  ;;  %369 = vadd.xlane.f32.xlu0 %v368_v12 }
 0x181   :  { %v1054_v14 = vpop.eup %783 }
 0x182   :  { %v1056_v15 = vpop.eup %785  ;;  %v371_v16 = vsel %vm235_vm1, %v1054_v14, 0.0 }
 0x183   :  { %v374_v18 = vsel %vm235_vm1, %v1056_v15, 0.0 }
 0x184   :  { %372 = vadd.xlane.f32.xlu1 %v371_v16  ;;  %375 = vadd.xlane.f32.xlu0 %v374_v18 }
 0x185   :  { %v1068_v20 = vpop.eup %787 }
 0x186   :  { %v377_v21 = vsel %vm235_vm1, %v1068_v20, 0.0 }
 0x188   :  { %378 = vadd.xlane.f32.xlu1 %v377_v21 }
 0x1f0   :  { %v334_v22 = vpop.xlane.xlu0 %333 }
 0x1f1   :  { %789 = vrcp.f32 %v334_v22 }
 0x1f4   :  { %v340_v23 = vpop.xlane.xlu0 %339 }
 0x1f5   :  { %v337_v24 = vpop.xlane.xlu1 %336  ;;  %791 = vrcp.f32 %v340_v23 }
 0x1f6   :  { %793 = vrcp.f32 %v337_v24 }
 0x1f9   :  { %v343_v25 = vpop.xlane.xlu1 %342  ;;  %v346_v26 = vpop.xlane.xlu0 %345 }
 0x1fa   :  { %795 = vrcp.f32 %v343_v25 }
 0x1fb   :  { %797 = vrcp.f32 %v346_v26 }
 0x1fd   :  { %v349_v28 = vpop.xlane.xlu1 %348  ;;  %v352_v29 = vpop.xlane.xlu0 %351 }
 0x1fe   :  { %v790_v30 = vpop.eup %789  ;;  %799 = vrcp.f32 %v349_v28 }
 0x1ff   :  { %801 = vrcp.f32 %v352_v29  ;;  %v396_v31 = vmul.f32 %v790_v30, %v989_v27 }
 0x201   :  { %v355_v32 = vpop.xlane.xlu1 %354  ;;  %v358_v33 = vpop.xlane.xlu0 %357  ;;  %733 = vmatprep.mubr.msk.f32.mxu1 %vm235_vm1, %v396_v31 }
 0x202   :  { %v792_v34 = vpop.eup %791  ;;  %803 = vrcp.f32 %v355_v32 }
 0x203   :  { %v794_v37 = vpop.eup %793  ;;  %805 = vrcp.f32 %v358_v33  ;;  %v398_v38 = vmul.f32 %v792_v34, %v995_v35 }
 0x204   :  { %v397_v39 = vmul.f32 %v794_v37, %v997_v36 }
 0x205   :  { %v361_v40 = vpop.xlane.xlu1 %360  ;;  %v364_v41 = vpop.xlane.xlu0 %363 }
 0x206   :  { %807 = vrcp.f32 %v361_v40  ;;  %734 = vmatmul.mubr.msk.f32.vlgmr.msra.gmra.mxu1 %vm235_vm1, %v397_v39 }
 0x207   :  { %v796_v42 = vpop.eup %795  ;;  %809 = vrcp.f32 %v364_v41  ;;  %736 = vmatprep.mubr.msk.f32.mxu1 %vm235_vm1, %v398_v38 }
 0x208   :  { %v798_v27 = vpop.eup %797  ;;  %v399_v43 = vmul.f32 %v796_v42, %v1005_v45 }
 0x209   :  { %v367_v44 = vpop.xlane.xlu1 %366  ;;  %v370_v47 = vpop.xlane.xlu0 %369  ;;  %v400_v48 = vmul.f32 %v798_v27, %v1007_v46 }
 0x20a   :  { %811 = vrcp.f32 %v367_v44  ;;  %737 = vmatmul.mubr.msk.f32.gmra.mxu1 %vm235_vm1, %v399_v43 }
 0x20b   :  { %v800_v35 = vpop.eup %799  ;;  %813 = vrcp.f32 %v370_v47  ;;  %739 = vmatprep.mubr.msk.f32.mxu1 %vm235_vm1, %v400_v48 }
 0x20c   :  { %v802_v36 = vpop.eup %801  ;;  %v401_v49 = vmul.f32 %v800_v35, %v1015_v55 }
 0x20d   :  { %v373_v50 = vpop.xlane.xlu1 %372  ;;  %v376_v52 = vpop.xlane.xlu0 %375  ;;  %v402_v53 = vmul.f32 %v802_v36, %v1017_v56 }
 0x20e   :  { %815 = vrcp.f32 %v373_v50  ;;  %740 = vmatmul.mubr.msk.f32.gmra.mxu1 %vm235_vm1, %v401_v49 }
 0x20f   :  { %v804_v45 = vpop.eup %803  ;;  %817 = vrcp.f32 %v376_v52  ;;  %742 = vmatprep.mubr.msk.f32.mxu1 %vm235_vm1, %v402_v53 }
 0x210   :  { %v806_v46 = vpop.eup %805  ;;  %v403_v51 = vmul.f32 %v804_v45, %v1024_v61 }
 0x211   :  { %v379_v54 = vpop.xlane.xlu1 %378  ;;  %v404_v58 = vmul.f32 %v806_v46, %v1026_v1 }
 0x212   :  { %819 = vrcp.f32 %v379_v54  ;;  %743 = vmatmul.mubr.msk.f32.gmra.mxu1 %vm235_vm1, %v403_v51 }
 0x213   :  { %v808_v55 = vpop.eup %807  ;;  %745 = vmatprep.mubr.msk.f32.mxu1 %vm235_vm1, %v404_v58 }
 0x214   :  { %v810_v56 = vpop.eup %809  ;;  %v405_v59 = vmul.f32 %v808_v55, %v1032_v5 }
 0x215   :  { %v406_v60 = vmul.f32 %v810_v56, %v1034_v62 }
 0x216   :  { %746 = vmatmul.mubr.msk.f32.gmra.mxu1 %vm235_vm1, %v405_v59 }
 0x217   :  { %v812_v63 = vpop.eup %811  ;;  %748 = vmatprep.mubr.msk.f32.mxu1 %vm235_vm1, %v406_v60 }
 0x218   :  { %v814_v0 = vpop.eup %813  ;;  %v407_v57 = vmul.f32 %v812_v63, %v1040_v8 }
 0x219   :  { %v408_v61 = vmul.f32 %v814_v0, %v1042_v9 }
 0x21a   :  { %749 = vmatmul.mubr.msk.f32.gmra.mxu1 %vm235_vm1, %v407_v57 }
 0x21b   :  { %v816_v1 = vpop.eup %815  ;;  %751 = vmatprep.mubr.msk.f32.mxu1 %vm235_vm1, %v408_v61 }
 0x21c   :  { %v818_v2 = vpop.eup %817  ;;  %v409_v3 = vmul.f32 %v816_v1, %v1054_v14 }
 0x21d   :  { %v410_v4 = vmul.f32 %v818_v2, %v1056_v15 }
 0x21e   :  { %752 = vmatmul.mubr.msk.f32.gmra.mxu1 %vm235_vm1, %v409_v3 }
 0x21f   :  { %v820_v5 = vpop.eup %819  ;;  %754 = vmatprep.mubr.msk.f32.mxu1 %vm235_vm1, %v410_v4 }
 0x220   :  { %v411_v62 = vmul.f32 %v820_v5, %v1068_v20 }
 0x222   :  { %755 = vmatmul.mubr.msk.f32.gmra.mxu1 %vm235_vm1, %v411_v62 }
 0x2c6   :  { %v735_v6 = vpop.f32.mrf.mxu1 }
 0x2c7   :  { %610 = vst.msk [vmem:[%s1172_s4 + $0x8] sm:$0xff] %vm41_vm0, %v735_v6 }
 0x2c8   :  { %v530_v7 = vpop.f32.mrf.mxu1 }
 0x2c9   :  { %609 = vst.msk [vmem:[%s1172_s4] sm:$0xff] %vm41_vm0, %v530_v7 }
 0x2ca   :  { %v738_v8 = vpop.f32.mrf.mxu1 }
 0x2cb   :  { %612 = vst.msk [vmem:[%s1172_s4 + $0x18] sm:$0xff] %vm41_vm0, %v738_v8 }
 0x2cc   :  { %v540_v9 = vpop.f32.mrf.mxu1 }
 0x2cd   :  { %611 = vst.msk [vmem:[%s1172_s4 + $0x10] sm:$0xff] %vm41_vm0, %v540_v9 }
 0x2ce   :  { %v741_v10 = vpop.f32.mrf.mxu1 }
 0x2cf   :  { %614 = vst.msk [vmem:[%s1172_s4 + $0x28] sm:$0xff] %vm41_vm0, %v741_v10 }
 0x2d0   :  { %v550_v11 = vpop.f32.mrf.mxu1 }
 0x2d1   :  { %613 = vst.msk [vmem:[%s1172_s4 + $0x20] sm:$0xff] %vm41_vm0, %v550_v11 }
 0x2d2   :  { %v744_v12 = vpop.f32.mrf.mxu1 }
 0x2d3   :  { %616 = vst.msk [vmem:[%s1172_s4 + $0x38] sm:$0xff] %vm41_vm0, %v744_v12 }
 0x2d4   :  { %v560_v13 = vpop.f32.mrf.mxu1 }
 0x2d5   :  { %615 = vst.msk [vmem:[%s1172_s4 + $0x30] sm:$0xff] %vm41_vm0, %v560_v13 }
 0x2d6   :  { %v747_v14 = vpop.f32.mrf.mxu1 }
 0x2d7   :  { %618 = vst.msk [vmem:[%s1172_s4 + $0x48] sm:$0xff] %vm41_vm0, %v747_v14 }
 0x2d8   :  { %v570_v15 = vpop.f32.mrf.mxu1 }
 0x2d9   :  { %617 = vst.msk [vmem:[%s1172_s4 + $0x40] sm:$0xff] %vm41_vm0, %v570_v15 }
 0x2da   :  { %v750_v16 = vpop.f32.mrf.mxu1 }
 0x2db   :  { %620 = vst.msk [vmem:[%s1172_s4 + $0x58] sm:$0xff] %vm41_vm0, %v750_v16 }
 0x2dc   :  { %v580_v17 = vpop.f32.mrf.mxu1 }
 0x2dd   :  { %619 = vst.msk [vmem:[%s1172_s4 + $0x50] sm:$0xff] %vm41_vm0, %v580_v17 }
 0x2de   :  { %v753_v18 = vpop.f32.mrf.mxu1 }
 0x2df   :  { %622 = vst.msk [vmem:[%s1172_s4 + $0x68] sm:$0xff] %vm41_vm0, %v753_v18 }
 0x2e0   :  { %v590_v19 = vpop.f32.mrf.mxu1 }
 0x2e1   :  { %621 = vst.msk [vmem:[%s1172_s4 + $0x60] sm:$0xff] %vm41_vm0, %v590_v19 }
 0x2e2   :  { %v756_v20 = vpop.f32.mrf.mxu1 }
 0x2e3   :  { %624 = vst.msk [vmem:[%s1172_s4 + $0x78] sm:$0xff] %vm41_vm0, %v756_v20 }
 0x2e4   :  { %v600_v21 = vpop.f32.mrf.mxu1 }
 0x2e5   :  { %623 = vst.msk [vmem:[%s1172_s4 + $0x70] sm:$0xff] %vm41_vm0, %v600_v21 }

</bundles_post_ra>
